<compile_context>
chip_gen: v7x
topology: tpu7x:2x2x1
jax: 0.10.0
libtpu: 0.0.40
codegen_flags: <defaults>
</compile_context>

<pallas_src>
import functools

import jax
import jax.numpy as jnp
import numpy as np
from jax.experimental import pallas as pl
from jax.experimental.pallas import tpu as pltpu


def _line_nll_kernel(line_ref, beta_ref, tgt_ref, c_ref, out_ref):
    beta = beta_ref[...]
    nll = jnp.abs(line_ref[...] - tgt_ref[...]) / beta + jnp.log(beta) + c_ref[...]
    out_ref[0] = jnp.sum(nll, axis=0, keepdims=True)


def _line_nll_weighted_kernel(line_ref, beta_ref, tgt_ref, w_ref, c_ref, out_ref):
    beta = beta_ref[...]
    nll = jnp.abs(line_ref[...] - tgt_ref[...]) / beta + jnp.log(beta) + c_ref[...]
    out_ref[0] = jnp.sum(nll * w_ref[...], axis=0, keepdims=True)


class SparseLineLossPallas:
    """JAX/Pallas re-implementation of SparseLineLoss.forward."""

    _LANES = 128
    _TARGET_TILE_ROWS = 2048      # ~1 MiB f32 per input block -> near HBM roofline
    _FAST_PATH_ELEMS = 16384      # below this, pure-jnp is faster than a launch

    def __init__(self, num_sample=20, roi_size=(30.0, 60.0)):
        self.num_sample = num_sample
        self.roi_size = roi_size
        eps = 1e-5
        nx = float(roi_size[0]) + eps
        ny = float(roi_size[1]) + eps
        ln2 = float(np.log(2.0))
        # Per-lane constant c[l] = ln2 - log(norm_{l%2}); period 2 divides 128.
        c = np.tile(np.array([ln2 - np.log(nx), ln2 - np.log(ny)], np.float32),
                    self._LANES // 2).reshape(1, self._LANES)
        self._c128 = jnp.asarray(c)
        # beta pad values: beta_pad = norm/2 makes the padded-element NLL == 0.
        self._half_norm = jnp.asarray(np.array([nx / 2.0, ny / 2.0], np.float32))
        # Full-D vectors for the small-input fast path (literal torch form).
        self._norm_d = jnp.asarray(np.tile(np.array([nx, ny], np.float32), num_sample))
        self._origin_d = jnp.asarray(
            np.tile(np.array([-roi_size[0] / 2.0, -roi_size[1] / 2.0], np.float32),
                    num_sample))

    # ---------------- small-input fast path (no pallas launch) ----------------
    @functools.partial(jax.jit, static_argnums=(0,))
    def _small(self, line, beta, tgt, weight, inv_avg):
        line_n = (line - self._origin_d) / self._norm_d
        tgt_n = (tgt - self._origin_d) / self._norm_d
        beta_n = beta / self._norm_d
        nll = jnp.abs(line_n - tgt_n) / beta_n + jnp.log(2.0 * beta_n)
        if weight is not None:
            nll = nll * weight
        return jnp.sum(nll) * inv_avg

    # --------------------------- pallas path ---------------------------------
    @functools.partial(jax.jit, static_argnums=(0,))
    def _run(self, line, beta, tgt, weight, inv_avg):
        lanes = self._LANES
        total = line.size                                  # static under jit
        rows = -(-total // lanes)
        nblk = max(1, -(-rows // self._TARGET_TILE_ROWS))  # balanced row tiles
        tm = -(-rows // nblk)
        tm = ((tm + 7) // 8) * 8                           # sublane aligned
        padded_rows = nblk * tm
        pad = padded_rows * lanes - total                  # total is even (D=2*ns)

        beta_pad = None
        if pad:
            beta_pad = jnp.tile(self._half_norm, pad // 2 + 1)[:pad]

        def flat(x, pad_vals=None):
            x = x.reshape(-1)
            if pad:
                if pad_vals is None:
                    x = jnp.pad(x, (0, pad))
                else:
                    x = jnp.concatenate([x, pad_vals])
            return x.reshape(padded_rows, lanes)

        line_f = flat(line)
        tgt_f = flat(tgt)
        beta_f = flat(beta, beta_pad)

        blk = pl.BlockSpec((tm, lanes), lambda i: (i, 0))
        c_spec = pl.BlockSpec((1, lanes), lambda i: (0, 0))
        # Lane-dense (1,128) partial-sum row per grid step; leading axis has
        # block size 1 so the last two block dims stay (1, 128) == full dims.
        out_spec = pl.BlockSpec((1, 1, lanes), lambda i: (i, 0, 0))
        out_shape = jax.ShapeDtypeStruct((nblk, 1, lanes), jnp.float32)

        if weight is None:
            kernel = _line_nll_kernel
            in_specs = [blk, blk, blk, c_spec]
            args = (line_f, beta_f, tgt_f, self._c128)
        else:
            kernel = _line_nll_weighted_kernel
            in_specs = [blk, blk, blk, blk, c_spec]
            args = (line_f, beta_f, tgt_f, flat(weight), self._c128)

        partials = pl.pallas_call(
            kernel,
            out_shape=out_shape,
            grid_spec=pltpu.PrefetchScalarGridSpec(
                num_scalar_prefetch=0,
                grid=(nblk,),
                in_specs=in_specs,
                out_specs=out_spec,
            ),
            compiler_params=pltpu.CompilerParams(
                dimension_semantics=("parallel",)),
        )(*args)

        return jnp.sum(partials) * inv_avg

    # ------------------------------ forward ----------------------------------
    def __call__(self, line, beta, line_target, weight=None, avg_factor=None,
                 prefix='', suffix=''):
        key = f'{prefix}loss_line{suffix}'
        line = jnp.asarray(line, jnp.float32)
        beta = jnp.asarray(beta, jnp.float32)
        line_target = jnp.asarray(line_target, jnp.float32)

        if line.shape[0] == 0:
            return {key: jnp.float32(0.0)}

        if weight is not None:
            weight = jnp.broadcast_to(jnp.asarray(weight, jnp.float32), line.shape)

        if avg_factor is None:
            inv_avg = jnp.float32(1.0 / float(line.size))   # 'mean' over elements
        else:
            inv_avg = jnp.float32(1.0 / float(avg_factor))

        if line.size <= self._FAST_PATH_ELEMS:
            loss = self._small(line, beta, line_target, weight, inv_avg)
        else:
            loss = self._run(line, beta, line_target, weight, inv_avg)
        return {key: loss}


# ------------------------- pure-jnp reference (torch form) -------------------
def _reference(line, beta, tgt, weight, num_sample, roi_size, avg_factor):
    eps = 1e-5
    norm = jnp.tile(jnp.asarray([roi_size[0] + eps, roi_size[1] + eps], jnp.float32),
                    num_sample)
    origin = jnp.tile(jnp.asarray([-roi_size[0] / 2.0, -roi_size[1] / 2.0],
                                  jnp.float32), num_sample)
    line_n = (line - origin) / norm
    tgt_n = (tgt - origin) / norm
    beta_n = beta / norm
    nll = jnp.abs(line_n - tgt_n) / beta_n + jnp.log(2.0 * beta_n)
    if weight is not None:
        nll = nll * weight
    total = jnp.sum(nll)
    if avg_factor is None:
        return total / line.size
    return total / avg_factor


if __name__ == "__main__":
    num_sample = 20
    roi_size = (30.0, 60.0)
    D = num_sample * 2
    loss_mod = SparseLineLossPallas(num_sample=num_sample, roi_size=roi_size)

    key = jax.random.PRNGKey(0)

    def make_inputs(k, n):
        k1, k2, k3, k4 = jax.random.split(k, 4)
        line = jax.random.uniform(k1, (n, D), jnp.float32, -15.0, 15.0)
        tgt = jax.random.uniform(k2, (n, D), jnp.float32, -15.0, 15.0)
        beta = jnp.abs(jax.random.normal(k3, (n, D), jnp.float32)) + 0.5
        w = jax.random.uniform(k4, (n, D), jnp.float32, 0.0, 1.0)
        return line, tgt, beta, w

    k1, k2, k3 = jax.random.split(key, 3)

    # 1) Pallas path: no weight, mean reduction, total not a multiple of 128
    #    (exercises the lane-dense padding + no-weight kernel).
    line, tgt, beta, _ = make_inputs(k1, 1029)
    got = jax.block_until_ready(loss_mod(line, beta, tgt)['loss_line'])
    ref = _reference(line, beta, tgt, None, num_sample, roi_size, None)
    assert np.allclose(np.asarray(got), np.asarray(ref), rtol=5e-4, atol=5e-4), \
        ("case1", got, ref)

    # 2) Pallas path: with elementwise weight and explicit avg_factor.
    line, tgt, beta, w = make_inputs(k2, 1024)
    avg = 1024.0
    got = jax.block_until_ready(
        loss_mod(line, beta, tgt, weight=w, avg_factor=avg)['loss_line'])
    ref = _reference(line, beta, tgt, w, num_sample, roi_size, avg)
    assert np.allclose(np.asarray(got), np.asarray(ref), rtol=5e-4, atol=5e-4), \
        ("case2", got, ref)

    # 3) Small-input fast path (original tiny test shape).
    line, tgt, beta, w = make_inputs(k3, 16)
    got = jax.block_until_ready(
        loss_mod(line, beta, tgt, weight=w, avg_factor=16.0)['loss_line'])
    ref = _reference(line, beta, tgt, w, num_sample, roi_size, 16.0)
    assert np.allclose(np.asarray(got), np.asarray(ref), rtol=5e-4, atol=5e-4), \
        ("case3", got, ref)

    print("KERNEL_OK")
</pallas_src>

<mosaic_0001>
module attributes {stable_mosaic.version = 11 : i64} {
  func.func @_line_nll_kernel(%arg0: i32, %arg1: memref<328x128xf32, #tpu.memory_space<vmem>>, %arg2: memref<328x128xf32, #tpu.memory_space<vmem>>, %arg3: memref<328x128xf32, #tpu.memory_space<vmem>>, %arg4: memref<1x128xf32, #tpu.memory_space<vmem>>, %arg5: memref<1x1x128xf32, #tpu.memory_space<vmem>>) attributes {dimension_semantics = [#tpu.dimension_semantics<parallel>], iteration_bounds = array<i64: 1>, scalar_prefetch = 0 : i64, scratch_operands = 0 : i64, tpu.core_type = #tpu.core_type<tc>, window_params = [{transform_indices = @transform_0, window_bounds = array<i64: 328, 128>}, {transform_indices = @transform_1, window_bounds = array<i64: 328, 128>}, {transform_indices = @transform_2, window_bounds = array<i64: 328, 128>}, {pipeline_mode = #tpu.pipeline_mode<synchronous>, transform_indices = @transform_3, window_bounds = array<i64: 1, 128>}, {transform_indices = @transform_4, window_bounds = array<i64: 1, 1, 128>}]} {
    %c0 = arith.constant 0 : index
    %c0_0 = arith.constant 0 : index
    %0 = vector.load %arg2[%c0, %c0_0] : memref<328x128xf32, #tpu.memory_space<vmem>>, vector<328x128xf32>
    %c0_1 = arith.constant 0 : index
    %c0_2 = arith.constant 0 : index
    %1 = vector.load %arg1[%c0_1, %c0_2] : memref<328x128xf32, #tpu.memory_space<vmem>>, vector<328x128xf32>
    %c0_3 = arith.constant 0 : index
    %c0_4 = arith.constant 0 : index
    %2 = vector.load %arg3[%c0_3, %c0_4] : memref<328x128xf32, #tpu.memory_space<vmem>>, vector<328x128xf32>
    %3 = arith.subf %1, %2 : vector<328x128xf32>
    %4 = math.absf %3 : vector<328x128xf32>
    %5 = arith.divf %4, %0 : vector<328x128xf32>
    %6 = math.log %0 : vector<328x128xf32>
    %7 = arith.addf %5, %6 : vector<328x128xf32>
    %c0_5 = arith.constant 0 : index
    %c0_6 = arith.constant 0 : index
    %8 = vector.load %arg4[%c0_5, %c0_6] : memref<1x128xf32, #tpu.memory_space<vmem>>, vector<1x128xf32>
    %9 = vector.broadcast %8 : vector<1x128xf32> to vector<328x128xf32>
    %10 = arith.addf %7, %9 : vector<328x128xf32>
    %cst = arith.constant dense<0.000000e+00> : vector<128xf32>
    %11 = vector.multi_reduction <add>, %10, %cst [0] : vector<328x128xf32> to vector<128xf32>
    %12 = vector.shape_cast %11 : vector<128xf32> to vector<1x128xf32>
    %c0_7 = arith.constant 0 : index
    %c0_8 = arith.constant 0 : index
    %c0_9 = arith.constant 0 : index
    %13 = vector.load %arg5[%c0_7, %c0_8, %c0_9] : memref<1x1x128xf32, #tpu.memory_space<vmem>>, vector<1x1x128xf32>
    %14 = vector.shape_cast %13 : vector<1x1x128xf32> to vector<1x128xf32>
    %15 = vector.shape_cast %12 : vector<1x128xf32> to vector<1x1x128xf32>
    tpu.vector_store %arg5[%c0_7, %c0_8, %c0_9], %15 {strides = array<i32>} : memref<1x1x128xf32, #tpu.memory_space<vmem>>, vector<1x1x128xf32>,
    return
  }
  func.func @transform_0(%arg0: i32) -> (i32, i32) {
    %c0_i32 = arith.constant 0 : i32
    %c0_i32_0 = arith.constant 0 : i32
    return %arg0, %c0_i32 : i32, i32
  }
  func.func @transform_1(%arg0: i32) -> (i32, i32) {
    %c0_i32 = arith.constant 0 : i32
    %c0_i32_0 = arith.constant 0 : i32
    return %arg0, %c0_i32 : i32, i32
  }
  func.func @transform_2(%arg0: i32) -> (i32, i32) {
    %c0_i32 = arith.constant 0 : i32
    %c0_i32_0 = arith.constant 0 : i32
    return %arg0, %c0_i32 : i32, i32
  }
  func.func @transform_3(%arg0: i32) -> (i32, i32) {
    %c0_i32 = arith.constant 0 : i32
    %c0_i32_0 = arith.constant 0 : i32
    %c0_i32_1 = arith.constant 0 : i32
    return %c0_i32, %c0_i32_0 : i32, i32
  }
  func.func @transform_4(%arg0: i32) -> (i32, i32, i32) {
    %c0_i32 = arith.constant 0 : i32
    %c0_i32_0 = arith.constant 0 : i32
    %c0_i32_1 = arith.constant 0 : i32
    return %arg0, %c0_i32, %c0_i32_0 : i32, i32, i32
  }
}

</mosaic_0001>

<bundles_post_ra>
// kernel: _run.1
= control target key start
LH: loop header
LB: loop body
LE: loop exit
PB: predicated region body
PF: predicated region fallthrough
CT: control target
= control target key end

     0   :  { %s1637_s0 = inlined_call_operand.vmem [shape: f32[328,128], index: 0, kind: input, shape index: {}]   ;;  %s1638_s1 = inlined_call_operand.vmem [shape: f32[328,128], index: 1, kind: input, shape index: {}]   ;;  %s1639_s2 = inlined_call_operand.vmem [shape: f32[328,128], index: 2, kind: input, shape index: {}]   ;;  %s1640_s3 = inlined_call_operand.vmem [shape: f32[1,128], index: 3, kind: input, shape index: {}]   ;;  %s1641_s4 = inlined_call_operand.vmem [shape: f32[1,1,128], index: 4, kind: output, shape index: {}]  }
   0x1   :  { %v719_v0 = vld [vmem:[%s1637_s0 + $0x108] sm:$0xff]  ;;  %v724_v1 = vld [vmem:[%s1637_s0 + $0x110] sm:$0xff]  ;;  %v729_v2 = vld [vmem:[%s1637_s0 + $0x118] sm:$0xff] }
   0x2   :  { %v734_v3 = vld [vmem:[%s1637_s0 + $0x120] sm:$0xff]  ;;  %v739_v4 = vld [vmem:[%s1637_s0 + $0x128] sm:$0xff]  ;;  %v744_v5 = vld [vmem:[%s1637_s0 + $0x130] sm:$0xff] }
   0x3   :  { %v749_v6 = vld [vmem:[%s1637_s0 + $0x138] sm:$0xff]  ;;  %v754_v7 = vld [vmem:[%s1638_s1] sm:$0xff]  ;;  %v764_v9 = vld [vmem:[%s1639_s2 + $0x108] sm:$0xff] }
   0x4   :  { %v759_v8 = vld [vmem:[%s1637_s0 + $0x140] sm:$0xff]  ;;  %v769_v10 = vld [vmem:[%s1639_s2 + $0x110] sm:$0xff]  ;;  %v774_v11 = vld [vmem:[%s1639_s2 + $0x118] sm:$0xff]  ;;  %v173_v14 = vsub.f32 %v719_v0, %v764_v9  ;;  %527 = vrcp.f32 %v754_v7 }
   0x5   :  { %v779_v12 = vld [vmem:[%s1639_s2 + $0x120] sm:$0xff]  ;;  %v784_v13 = vld [vmem:[%s1639_s2 + $0x128] sm:$0xff]  ;;  %v174_v15 = vsub.f32 %v724_v1, %v769_v10  ;;  %v793_v16 = vld [vmem:[%s1639_s2 + $0x130] sm:$0xff]  ;;  %v1671_v9 = vsub.f32 %v729_v2, %v774_v11 }
   0x6   :  { %v798_v17 = vld [vmem:[%s1639_s2 + $0x138] sm:$0xff]  ;;  %v803_v18 = vld [vmem:[%s1639_s2 + $0x140] sm:$0xff]  ;;  %v814_v22 = vld [vmem:[%s1638_s1 + $0x8] sm:$0xff]  ;;  %v214_v21 = vand.u32 2147483647, %v173_v14  ;;  %v1673_v10 = vsub.f32 %v734_v3, %v779_v12  ;;  %v1675_v11 = vsub.f32 %v739_v4, %v784_v13  ;;  %v1678_v12 = vsub.f32 %v744_v5, %v793_v16 }
   0x7   :  { %v825_v26 = vld [vmem:[%s1638_s1 + $0x10] sm:$0xff]  ;;  %v830_v27 = vld [vmem:[%s1638_s1 + $0x18] sm:$0xff]  ;;  %v836_v28 = vld [vmem:[%s1638_s1 + $0x20] sm:$0xff]  ;;  %529 = vrcp.f32 %v814_v22  ;;  %v216_v14 = vand.u32 2147483647, %v1671_v9 }
   0x8   :  { %v842_v29 = vld [vmem:[%s1638_s1 + $0x28] sm:$0xff]  ;;  %531 = vrcp.f32 %v825_v26  ;;  %v848_v30 = vld [vmem:[%s1638_s1 + $0x30] sm:$0xff]  ;;  %v854_v31 = vld [vmem:[%s1638_s1 + $0x38] sm:$0xff]  ;;  %v218_v9 = vand.u32 2147483647, %v1675_v11 }
   0x9   :  { %533 = vrcp.f32 %v830_v27  ;;  %v860_v32 = vld [vmem:[%s1638_s1 + $0x40] sm:$0xff]  ;;  %v866_v33 = vld [vmem:[%s1638_s1 + $0x48] sm:$0xff]  ;;  %v872_v34 = vld [vmem:[%s1638_s1 + $0x50] sm:$0xff] }
   0xa   :  { %535 = vrcp.f32 %v836_v28  ;;  %v878_v35 = vld [vmem:[%s1638_s1 + $0x58] sm:$0xff]  ;;  %v884_v36 = vld [vmem:[%s1638_s1 + $0x60] sm:$0xff]  ;;  %v892_v38 = vld [vmem:[%s1638_s1 + $0x68] sm:$0xff] }
   0xb   :  { %537 = vrcp.f32 %v842_v29  ;;  %v900_v40 = vld [vmem:[%s1638_s1 + $0x70] sm:$0xff]  ;;  %v908_v42 = vld [vmem:[%s1638_s1 + $0x78] sm:$0xff]  ;;  %v916_v44 = vld [vmem:[%s1638_s1 + $0x80] sm:$0xff] }
   0xc   :  { %539 = vrcp.f32 %v848_v30  ;;  %v924_v46 = vld [vmem:[%s1638_s1 + $0x108] sm:$0xff]  ;;  %v932_v48 = vld [vmem:[%s1638_s1 + $0x110] sm:$0xff]  ;;  %v940_v50 = vld [vmem:[%s1638_s1 + $0x118] sm:$0xff] }
   0xd   :  { %541 = vrcp.f32 %v854_v31  ;;  %v948_v52 = vld [vmem:[%s1638_s1 + $0x120] sm:$0xff]  ;;  %v956_v54 = vld [vmem:[%s1638_s1 + $0x128] sm:$0xff]  ;;  %v964_v56 = vld [vmem:[%s1638_s1 + $0x130] sm:$0xff] }
   0xe   :  { %543 = vrcp.f32 %v860_v32  ;;  %v887_v37 = vpop.eup %527  ;;  %v972_v58 = vld [vmem:[%s1638_s1 + $0x138] sm:$0xff]  ;;  %v980_v60 = vld [vmem:[%s1638_s1 + $0x140] sm:$0xff]  ;;  %v988_v62 = vld [vmem:[%s1638_s1 + $0x88] sm:$0xff] }
   0xf   :  { %545 = vrcp.f32 %v866_v33  ;;  %1660 = vst [vmem:[#allocation3_spill] sm:$0xff] %v980_v60  ;;  %1662 = vst [vmem:[#allocation5_spill] sm:$0xff] %v988_v62  ;;  %v996_v25 = vld [vmem:[%s1638_s1 + $0x90] sm:$0xff]  ;;  %v1004_v23 = vld [vmem:[%s1638_s1 + $0x98] sm:$0xff] }
  0x10   :  { %547 = vrcp.f32 %v872_v34  ;;  %1664 = vst [vmem:[#allocation7_spill] sm:$0xff] %v996_v25  ;;  %1666 = vst [vmem:[#allocation9_spill] sm:$0xff] %v1004_v23  ;;  %v1015_v19 = vld [vmem:[%s1638_s1 + $0xa0] sm:$0xff]  ;;  %v1026_v0 = vld [vmem:[%s1638_s1 + $0xa8] sm:$0xff] }
  0x11   :  { %v895_v39 = vpop.eup %529  ;;  %549 = vrcp.f32 %v878_v35  ;;  %1668 = vst [vmem:[#allocation11_spill] sm:$0xff] %v1015_v19  ;;  %1670 = vst [vmem:[#allocation13_spill] sm:$0xff] %v1026_v0  ;;  %v1035_v1 = vld [vmem:[%s1638_s1 + $0xb0] sm:$0xff]  ;;  %v1044_v2 = vld [vmem:[%s1638_s1 + $0xb8] sm:$0xff] }
  0x12   :  { %v903_v41 = vpop.eup %531  ;;  %551 = vrcp.f32 %v884_v36  ;;  %1672 = vst [vmem:[#allocation14_spill] sm:$0xff] %v1035_v1  ;;  %1674 = vst [vmem:[#allocation15_spill] sm:$0xff] %v1044_v2  ;;  %v1055_v3 = vld [vmem:[%s1638_s1 + $0xc0] sm:$0xff]  ;;  %v1066_v13 = vld [vmem:[%s1638_s1 + $0xc8] sm:$0xff] }
  0x13   :  { %v911_v43 = vpop.eup %533  ;;  %553 = vrcp.f32 %v892_v38  ;;  %1677 = vst [vmem:[#allocation17_spill] sm:$0xff] %v1055_v3  ;;  %1680 = vst [vmem:[#allocation19_spill] sm:$0xff] %v1066_v13  ;;  %v1077_v16 = vld [vmem:[%s1638_s1 + $0xd0] sm:$0xff] }
  0x14   :  { %v919_v45 = vpop.eup %535  ;;  %555 = vrcp.f32 %v900_v40  ;;  %1683 = vst [vmem:[#allocation21_spill] sm:$0xff] %v1077_v16 }
  0x15   :  { %v927_v47 = vpop.eup %537  ;;  %557 = vrcp.f32 %v908_v42 }
  0x16   :  { %v935_v49 = vpop.eup %539  ;;  %559 = vrcp.f32 %v916_v44 }
  0x17   :  { %v943_v51 = vpop.eup %541  ;;  %561 = vrcp.f32 %v924_v46 }
  0x18   :  { %v951_v53 = vpop.eup %543  ;;  %563 = vrcp.f32 %v932_v48 }
  0x19   :  { %v959_v55 = vpop.eup %545  ;;  %565 = vrcp.f32 %v940_v50 }
  0x1a   :  { %v967_v57 = vpop.eup %547  ;;  %567 = vrcp.f32 %v948_v52 }
  0x1b   :  { %v975_v59 = vpop.eup %549  ;;  %569 = vrcp.f32 %v956_v54 }
  0x1c   :  { %1659 = vst [vmem:[#allocation2_spill] sm:$0xff] %v975_v59  ;;  %v983_v61 = vpop.eup %551  ;;  %571 = vrcp.f32 %v964_v56 }
  0x1d   :  { %1661 = vst [vmem:[#allocation4_spill] sm:$0xff] %v983_v61  ;;  %v991_v63 = vpop.eup %553  ;;  %573 = vrcp.f32 %v972_v58 }
  0x1e   :  { %1663 = vst [vmem:[#allocation6_spill] sm:$0xff] %v991_v63  ;;  %v999_v24 = vpop.eup %555  ;;  %575 = vrcp.f32 %v980_v60  ;;  %v112_v60 = vld [vmem:[%s1639_s2 + $0x68] sm:$0xff] }
  0x1f   :  { %1665 = vst [vmem:[#allocation8_spill] sm:$0xff] %v999_v24  ;;  %v1010_v20 = vpop.eup %557  ;;  %v215_v24 = vand.u32 2147483647, %v174_v15  ;;  %577 = vrcp.f32 %v988_v62  ;;  %v217_v15 = vand.u32 2147483647, %v1673_v10  ;;  %v1282_v62 = vld [vmem:[%s1639_s2 + $0x58] sm:$0xff] }
  0x20   :  { %1667 = vst [vmem:[#allocation10_spill] sm:$0xff] %v1010_v20  ;;  %v1021_v63 = vpop.eup %559  ;;  %579 = vrcp.f32 %v996_v25  ;;  %v219_v10 = vand.u32 2147483647, %v1678_v12 }
  0x21   :  { %1669 = vst [vmem:[#allocation12_spill] sm:$0xff] %v1021_v63  ;;  %v562_v20 = vpop.eup %561  ;;  %581 = vrcp.f32 %v1004_v23 }
  0x22   :  { %v564_v63 = vpop.eup %563  ;;  %583 = vrcp.f32 %v1015_v19  ;;  %v1050_v25 = vmul.f32 %v562_v20, %v214_v21  ;;  %v1681_v20 = vsub.f32 %v749_v6, %v798_v17  ;;  %v1088_v17 = vld [vmem:[%s1638_s1 + $0xd8] sm:$0xff] }
  0x23   :  { %v566_v61 = vpop.eup %565  ;;  %585 = vrcp.f32 %v1026_v0  ;;  %v1061_v23 = vmul.f32 %v564_v63, %v215_v24  ;;  %v1684_v24 = vsub.f32 %v759_v8, %v803_v18  ;;  %1686 = vst [vmem:[#allocation23_spill] sm:$0xff] %v1088_v17  ;;  %v1096_v8 = vld [vmem:[%s1638_s1 + $0xe0] sm:$0xff] }
  0x24   :  { %1676 = vst [vmem:[#allocation16_spill] sm:$0xff] %v1050_v25  ;;  %v568_v4 = vpop.eup %567  ;;  %v220_v21 = vand.u32 2147483647, %v1681_v20  ;;  %587 = vrcp.f32 %v1035_v1  ;;  %v1072_v11 = vmul.f32 %v566_v61, %v216_v14  ;;  %1688 = vst [vmem:[#allocation25_spill] sm:$0xff] %v1096_v8  ;;  %v1222_v1 = vld [vmem:[%s1639_s2 + $0x28] sm:$0xff]  ;;  %v1277_v25 = vld [vmem:[%s1637_s0 + $0x78] sm:$0xff] }
  0x25   :  { %1679 = vst [vmem:[#allocation18_spill] sm:$0xff] %v1061_v23  ;;  %v570_v5 = vpop.eup %569  ;;  %v221_v63 = vand.u32 2147483647, %v1684_v24  ;;  %589 = vrcp.f32 %v1044_v2  ;;  %v1083_v12 = vmul.f32 %v568_v4, %v217_v15  ;;  %v1104_v4 = vld [vmem:[%s1638_s1 + $0xe8] sm:$0xff] }
  0x26   :  { %1682 = vst [vmem:[#allocation20_spill] sm:$0xff] %v1072_v11  ;;  %v572_v6 = vpop.eup %571  ;;  %591 = vrcp.f32 %v1055_v3  ;;  %v1091_v61 = vmul.f32 %v570_v5, %v218_v9  ;;  %1690 = vst [vmem:[#allocation27_spill] sm:$0xff] %v1104_v4  ;;  %v1114_v5 = vld [vmem:[%s1638_s1 + $0xf0] sm:$0xff]  ;;  %v100_v3 = vld [vmem:[%s1639_s2 + $0x8] sm:$0xff] }
  0x27   :  { %1685 = vst [vmem:[#allocation22_spill] sm:$0xff] %v1083_v12  ;;  %v574_v14 = vpop.eup %573  ;;  %593 = vrcp.f32 %v1066_v13  ;;  %v1099_v18 = vmul.f32 %v572_v6, %v219_v10  ;;  %1693 = vst [vmem:[#allocation30_spill] sm:$0xff] %v1114_v5  ;;  %v1124_v6 = vld [vmem:[%s1638_s1 + $0xf8] sm:$0xff]  ;;  %v1172_v13 = vld [vmem:[%s1637_s0 + $0x28] sm:$0xff] }
  0x28   :  { %1687 = vst [vmem:[#allocation24_spill] sm:$0xff] %v1091_v61  ;;  %v576_v15 = vpop.eup %575  ;;  %595 = vrcp.f32 %v1077_v16  ;;  %v1107_v9 = vmul.f32 %v574_v14, %v220_v21  ;;  %1696 = vst [vmem:[#allocation33_spill] sm:$0xff] %v1124_v6  ;;  %v99_v16 = vld [vmem:[%s1639_s2] sm:$0xff]  ;;  %v1204_v2 = vld [vmem:[%s1637_s0 + $0x48] sm:$0xff] }
  0x29   :  { %1689 = vst [vmem:[#allocation26_spill] sm:$0xff] %v1099_v18  ;;  %v1109_v20 = vpop.eup %577  ;;  %597 = vrcp.f32 %v1088_v17  ;;  %v1117_v10 = vmul.f32 %v576_v15, %v221_v63  ;;  %v1135_v63 = vld [vmem:[%s1638_s1 + $0x100] sm:$0xff]  ;;  %v105_v18 = vld [vmem:[%s1639_s2 + $0x30] sm:$0xff] }
  0x2a   :  { %1691 = vst [vmem:[#allocation28_spill] sm:$0xff] %v1107_v9  ;;  %1692 = vst [vmem:[#allocation29_spill] sm:$0xff] %v1109_v20  ;;  %v1119_v24 = vpop.eup %579  ;;  %599 = vrcp.f32 %v1096_v8  ;;  %v58_v15 = vld [vmem:[%s1637_s0] sm:$0xff]  ;;  %v1146_v8 = vld [vmem:[%s1637_s0 + $0x8] sm:$0xff] }
  0x2b   :  { %1694 = vst [vmem:[#allocation31_spill] sm:$0xff] %v1117_v10  ;;  %1695 = vst [vmem:[#allocation32_spill] sm:$0xff] %v1119_v24  ;;  %v1127_v21 = vpop.eup %581  ;;  %601 = vrcp.f32 %v1104_v4  ;;  %v1151_v4 = vld [vmem:[%s1637_s0 + $0x10] sm:$0xff]  ;;  %v1199_v24 = vld [vmem:[%s1637_s0 + $0x40] sm:$0xff]  ;;  %v140_v0 = vsub.f32 %v58_v15, %v99_v16  ;;  %v141_v12 = vsub.f32 %v1146_v8, %v100_v3 }
  0x2c   :  { %1697 = vst [vmem:[#allocation34_spill] sm:$0xff] %v1127_v21  ;;  %v1130_v14 = vpop.eup %583  ;;  %1699 = vst [vmem:[#allocation36_spill] sm:$0xff] %v1135_v63  ;;  %603 = vrcp.f32 %v1114_v5  ;;  %v1162_v5 = vld [vmem:[%s1637_s0 + $0x18] sm:$0xff]  ;;  %v1209_v20 = vld [vmem:[%s1637_s0 + $0x50] sm:$0xff] }
  0x2d   :  { %1698 = vst [vmem:[#allocation35_spill] sm:$0xff] %v1130_v14  ;;  %v1141_v17 = vpop.eup %585  ;;  %605 = vrcp.f32 %v1124_v6  ;;  %v1185_v21 = vld [vmem:[%s1637_s0 + $0x38] sm:$0xff]  ;;  %v1235_v9 = vld [vmem:[%s1637_s0 + $0x60] sm:$0xff] }
  0x2e   :  { %1700 = vst [vmem:[#allocation37_spill] sm:$0xff] %v1141_v17  ;;  %v1157_v14 = vpop.eup %587  ;;  %v1167_v17 = vld [vmem:[%s1637_s0 + $0x20] sm:$0xff]  ;;  %607 = vlog2.f32 %v754_v7  ;;  %v101_v7 = vld [vmem:[%s1639_s2 + $0x10] sm:$0xff]  ;;  %v1230_v10 = vld [vmem:[%s1637_s0 + $0x58] sm:$0xff] }
  0x2f   :  { %1701 = vst [vmem:[#allocation38_spill] sm:$0xff] %v1157_v14  ;;  %v1175_v6 = vpop.eup %589  ;;  %v1180_v14 = vld [vmem:[%s1637_s0 + $0x30] sm:$0xff]  ;;  %609 = vlog2.f32 %v814_v22  ;;  %v102_v22 = vld [vmem:[%s1639_s2 + $0x18] sm:$0xff]  ;;  %v107_v61 = vld [vmem:[%s1639_s2 + $0x40] sm:$0xff]  ;;  %v142_v11 = vsub.f32 %v1151_v4, %v101_v7  ;;  %v145_v4 = vsub.f32 %v1172_v13, %v1222_v1  ;;  %v181_v13 = vand.u32 2147483647, %v140_v0 }
  0x30   :  { %1702 = vst [vmem:[#allocation39_spill] sm:$0xff] %v1175_v6  ;;  %v1194_v6 = vpop.eup %591  ;;  %611 = vrcp.f32 %v1135_v63  ;;  %v106_v16 = vld [vmem:[%s1639_s2 + $0x38] sm:$0xff]  ;;  %v1249_v63 = vld [vmem:[%s1637_s0 + $0x68] sm:$0xff]  ;;  %v1287_v3 = vld [vmem:[%s1639_s2 + $0x60] sm:$0xff]  ;;  %v143_v8 = vsub.f32 %v1162_v5, %v102_v22  ;;  %v146_v1 = vsub.f32 %v1180_v14, %v105_v18  ;;  %v148_v0 = vsub.f32 %v1199_v24, %v107_v61 }
  0x31   :  { %1703 = vst [vmem:[#allocation40_spill] sm:$0xff] %v1194_v6  ;;  %v1217_v6 = vld [vmem:[%s1639_s2 + $0x20] sm:$0xff]  ;;  %v1225_v19 = vpop.eup %593  ;;  %613 = vlog2.f32 %v825_v26  ;;  %v1262_v26 = vld [vmem:[%s1639_s2 + $0x48] sm:$0xff]  ;;  %v114_v22 = vld [vmem:[%s1639_s2 + $0x78] sm:$0xff]  ;;  %v152_v61 = vsub.f32 %v1235_v9, %v1287_v3 }
  0x32   :  { %1704 = vst [vmem:[#allocation41_spill] sm:$0xff] %v1225_v19  ;;  %v1244_v15 = vpop.eup %595  ;;  %v1254_v19 = vld [vmem:[%s1637_s0 + $0x70] sm:$0xff]  ;;  %615 = vlog2.f32 %v830_v27  ;;  %v144_v27 = vsub.f32 %v1167_v17, %v1217_v6  ;;  %v1318_v6 = vld [vmem:[%s1637_s0 + $0x88] sm:$0xff]  ;;  %v1326_v18 = vld [vmem:[%s1639_s2 + $0x80] sm:$0xff]  ;;  %v155_v59 = vsub.f32 %v1277_v25, %v114_v22  ;;  %v184_v9 = vand.u32 2147483647, %v143_v8 }
  0x33   :  { %1705 = vst [vmem:[#allocation42_spill] sm:$0xff] %v1244_v15  ;;  %v1267_v15 = vld [vmem:[%s1639_s2 + $0x50] sm:$0xff]  ;;  %v1272_v23 = vpop.eup %597  ;;  %617 = vlog2.f32 %v836_v28  ;;  %v147_v28 = vsub.f32 %v1185_v21, %v106_v16  ;;  %v187_v25 = vand.u32 2147483647, %v146_v1 }
  0x34   :  { %1706 = vst [vmem:[#allocation43_spill] sm:$0xff] %v1272_v23  ;;  %v1295_v7 = vpop.eup %599  ;;  %v1300_v23 = vld [vmem:[%s1637_s0 + $0x80] sm:$0xff]  ;;  %v1308_v17 = vld [vmem:[%s1639_s2 + $0x70] sm:$0xff]  ;;  %619 = vlog2.f32 %v842_v29  ;;  %v149_v29 = vsub.f32 %v1204_v2, %v1262_v26  ;;  %v150_v21 = vsub.f32 %v1209_v20, %v1267_v15  ;;  %v182_v20 = vand.u32 2147483647, %v141_v12 }
  0x35   :  { %1707 = vst [vmem:[#allocation44_spill] sm:$0xff] %v1295_v7  ;;  %v1313_v5 = vpop.eup %601  ;;  %621 = vlog2.f32 %v848_v30  ;;  %v1339_v16 = vld [vmem:[%s1637_s0 + $0x90] sm:$0xff]  ;;  %v151_v30 = vsub.f32 %v1230_v10, %v1282_v62  ;;  %v153_v15 = vsub.f32 %v1249_v63, %v112_v60  ;;  %v154_v26 = vsub.f32 %v1254_v19, %v1308_v17 }
  0x36   :  { %1708 = vst [vmem:[#allocation45_spill] sm:$0xff] %v1313_v5  ;;  %v1334_v14 = vpop.eup %603  ;;  %v1344_v5 = vld [vmem:[%s1639_s2 + $0x88] sm:$0xff]  ;;  %v1349_v2 = vld [vmem:[%s1639_s2 + $0x90] sm:$0xff]  ;;  %623 = vlog2.f32 %v854_v31  ;;  %v156_v62 = vsub.f32 %v1300_v23, %v1326_v18  ;;  %v185_v19 = vand.u32 2147483647, %v144_v27  ;;  %v225_v27 = vmul.f32 %v895_v39, %v182_v20 }
  0x37   :  { %1709 = vst [vmem:[#allocation46_spill] sm:$0xff] %v1334_v14  ;;  %v1356_v24 = vpop.eup %605  ;;  %v183_v14 = vand.u32 2147483647, %v142_v11  ;;  %625 = vlog2.f32 %v860_v32  ;;  %v157_v12 = vsub.f32 %v1318_v6, %v1344_v5  ;;  %v158_v60 = vsub.f32 %v1339_v16, %v1349_v2 }
  0x38   :  { %v608_v7 = vpop.eup %607  ;;  %627 = vlog2.f32 %v866_v33  ;;  %v186_v11 = vand.u32 2147483647, %v145_v4  ;;  %v188_v10 = vand.u32 2147483647, %v147_v28  ;;  %v189_v63 = vand.u32 2147483647, %v148_v0 }
  0x39   :  { %v610_v31 = vpop.eup %609  ;;  %629 = vlog2.f32 %v872_v34  ;;  %v223_v33 = vmul.f32 %v887_v37, %v181_v13  ;;  %v305_v3 = vmul.f32 0.6931472, %v608_v7  ;;  %v190_v17 = vand.u32 2147483647, %v149_v29 }
  0x3a   :  { %v1371_v32 = vpop.eup %611  ;;  %631 = vlog2.f32 %v878_v35  ;;  %v307_v22 = vmul.f32 0.6931472, %v610_v31  ;;  %v191_v4 = vand.u32 2147483647, %v150_v21  ;;  %v192_v1 = vand.u32 2147483647, %v151_v30 }
  0x3b   :  { %v614_v23 = vpop.eup %613  ;;  %633 = vlog2.f32 %v884_v36  ;;  %v193_v28 = vand.u32 2147483647, %v152_v61  ;;  %v194_v18 = vand.u32 2147483647, %v153_v15  ;;  %v227_v37 = vmul.f32 %v903_v41, %v183_v14  ;;  %v1391_v41 = vld [vmem:[%s1640_s3] ss:$0 sm:$0xff] }
  0x3c   :  { %v616_v8 = vpop.eup %615  ;;  %635 = vlog2.f32 %v892_v38  ;;  %v309_v7 = vmul.f32 0.6931472, %v614_v23  ;;  %v1381_v13 = vand.u32 2147483647, %v154_v26  ;;  %v1383_v39 = vand.u32 2147483647, %v155_v59 }
  0x3d   :  { %v618_v34 = vpop.eup %617  ;;  %637 = vlog2.f32 %v900_v40  ;;  %v386_v38 = vadd.f32 %v305_v3, %v223_v33  ;;  %v229_v29 = vmul.f32 %v911_v43, %v184_v9  ;;  %v311_v21 = vmul.f32 0.6931472, %v616_v8 }
  0x3e   :  { %v620_v35 = vpop.eup %619  ;;  %639 = vlog2.f32 %v908_v42  ;;  %v387_v40 = vadd.f32 %v307_v22, %v225_v27  ;;  %v1393_v14 = vand.u32 2147483647, %v156_v62  ;;  %v231_v59 = vmul.f32 %v919_v45, %v185_v19 }
  0x3f   :  { %v622_v36 = vpop.eup %621  ;;  %641 = vlog2.f32 %v916_v44  ;;  %v233_v44 = vmul.f32 %v927_v47, %v186_v11  ;;  %v235_v43 = vmul.f32 %v935_v49, %v187_v25  ;;  %v313_v61 = vmul.f32 0.6931472, %v618_v34  ;;  %v1714_v34 = vld [vmem:[#allocation7_spill] sm:$0xff] }
  0x40   :  { %v624_v0 = vpop.eup %623  ;;  %643 = vlog2.f32 %v924_v46  ;;  %v388_v46 = vadd.f32 %v309_v7, %v227_v37  ;;  %v237_v15 = vmul.f32 %v943_v51, %v188_v10  ;;  %v315_v26 = vmul.f32 0.6931472, %v620_v35  ;;  %v1710_v10 = vld [vmem:[#allocation2_spill] sm:$0xff]  ;;  %v1716_v7 = vld [vmem:[#allocation9_spill] sm:$0xff] }
  0x41   :  { %v626_v42 = vpop.eup %625  ;;  %645 = vlog2.f32 %v932_v48  ;;  %v434_v62 = vadd.f32 %v1391_v41, %v386_v38  ;;  %v317_v9 = vmul.f32 0.6931472, %v622_v36  ;;  %v389_v47 = vadd.f32 %v311_v21, %v229_v29  ;;  %v1715_v35 = vld [vmem:[#allocation6_spill] sm:$0xff] }
  0x42   :  { %v628_v30 = vpop.eup %627  ;;  %647 = vlog2.f32 %v940_v50  ;;  %v435_v48 = vadd.f32 %v1391_v41, %v387_v40  ;;  %v239_v31 = vmul.f32 %v951_v53, %v189_v63  ;;  %v241_v50 = vmul.f32 %v959_v55, %v190_v17  ;;  %v1711_v53 = vld [vmem:[#allocation3_spill] sm:$0xff]  ;;  %v1713_v17 = vld [vmem:[#allocation4_spill] sm:$0xff] }
  0x43   :  { %v630_v20 = vpop.eup %629  ;;  %649 = vlog2.f32 %v948_v52  ;;  %v319_v19 = vmul.f32 0.6931472, %v624_v0  ;;  %v243_v52 = vmul.f32 %v967_v57, %v191_v4  ;;  %v390_v11 = vadd.f32 %v313_v61, %v231_v59 }
  0x44   :  { %v632_v45 = vpop.eup %631  ;;  %651 = vlog2.f32 %v956_v54  ;;  %v436_v54 = vadd.f32 %v1391_v41, %v388_v46  ;;  %v245_v23 = vmul.f32 %v1710_v10, %v192_v1  ;;  %v321_v33 = vmul.f32 0.6931472, %v626_v42  ;;  %v1719_v10 = vld [vmem:[#allocation20_spill] sm:$0xff] }
  0x45   :  { %v634_v49 = vpop.eup %633  ;;  %653 = vlog2.f32 %v964_v56  ;;  %v391_v55 = vadd.f32 %v315_v26, %v233_v44  ;;  %v1712_v56 = vld [vmem:[#allocation5_spill] sm:$0xff]  ;;  %v392_v3 = vadd.f32 %v317_v9, %v235_v43  ;;  %v437_v57 = vadd.f32 %v1391_v41, %v389_v47 }
  0x46   :  { %v1408_v51 = vpop.eup %635  ;;  %655 = vlog2.f32 %v972_v58  ;;  %v475_v8 = vadd.f32 %v435_v48, %v434_v62  ;;  %v1424_v27 = vmul.f32 %v1713_v17, %v193_v28  ;;  %v323_v22 = vmul.f32 0.6931472, %v628_v30  ;;  %v1718_v48 = vld [vmem:[#allocation18_spill] sm:$0xff] }
  0x47   :  { %v1413_v25 = vpop.eup %637  ;;  %657 = vlog2.f32 %v1711_v53  ;;  %v393_v4 = vadd.f32 %v319_v19, %v237_v15  ;;  %v1428_v37 = vmul.f32 %v1715_v35, %v194_v18  ;;  %v438_v36 = vadd.f32 %v1391_v41, %v390_v11  ;;  %v1717_v15 = vld [vmem:[#allocation16_spill] sm:$0xff] }
  0x48   :  { %v1417_v63 = vpop.eup %639  ;;  %659 = vlog2.f32 %v1712_v56  ;;  %v476_v38 = vadd.f32 %v475_v8, %v436_v54  ;;  %v325_v29 = vmul.f32 0.6931472, %v630_v20  ;;  %v394_v40 = vadd.f32 %v321_v33, %v239_v31  ;;  %v1720_v56 = vld [vmem:[#allocation22_spill] sm:$0xff] }
  0x49   :  { %v1421_v58 = vpop.eup %641  ;;  %661 = vlog2.f32 %v1714_v34  ;;  %v439_v28 = vadd.f32 %v1391_v41, %v391_v55  ;;  %v327_v59 = vmul.f32 0.6931472, %v632_v45  ;;  %v440_v30 = vadd.f32 %v1391_v41, %v392_v3 }
  0x4a   :  { %v644_v1 = vpop.eup %643  ;;  %663 = vlog2.f32 %v1716_v7  ;;  %v477_v43 = vadd.f32 %v476_v38, %v437_v57  ;;  %v395_v46 = vadd.f32 %v323_v22, %v241_v50  ;;  %v441_v62 = vadd.f32 %v1391_v41, %v393_v4  ;;  %v1721_v22 = vld [vmem:[#allocation24_spill] sm:$0xff]  ;;  %v1722_v7 = vld [vmem:[#allocation26_spill] sm:$0xff] }
  0x4b   :  { %v646_v0 = vpop.eup %645  ;;  %v371_v21 = vmul.f32 0.6931472, %v644_v1  ;;  %v329_v47 = vmul.f32 0.6931472, %v634_v49  ;;  %v396_v45 = vadd.f32 %v325_v29, %v243_v52  ;;  %v442_v4 = vadd.f32 %v1391_v41, %v394_v40 }
  0x4c   :  { %v648_v42 = vpop.eup %647  ;;  %v373_v44 = vmul.f32 0.6931472, %v646_v0  ;;  %v478_v19 = vadd.f32 %v477_v43, %v438_v36 }
  0x4d   :  { %v650_v61 = vpop.eup %649  ;;  %v375_v18 = vmul.f32 0.6931472, %v648_v42  ;;  %v419_v26 = vadd.f32 %v371_v21, %v1717_v15  ;;  %v331_v21 = vmul.f32 0.6931472, %v1408_v51  ;;  %v1723_v42 = vld [vmem:[#allocation28_spill] sm:$0xff]  ;;  %v443_v51 = vadd.f32 %v1391_v41, %v395_v46  ;;  %v119_v46 = vld [vmem:[%s1639_s2 + $0xa0] sm:$0xff] }
  0x4e   :  { %v652_v9 = vpop.eup %651  ;;  %v377_v20 = vmul.f32 0.6931472, %v650_v61  ;;  %v420_v31 = vadd.f32 %v373_v44, %v1718_v48  ;;  %v479_v49 = vadd.f32 %v478_v19, %v439_v28  ;;  %v397_v28 = vadd.f32 %v327_v59, %v245_v23  ;;  %v77_v61 = vld [vmem:[%s1637_s0 + $0x98] sm:$0xff]  ;;  %v1726_v48 = vld [vmem:[#allocation11_spill] sm:$0xff]  ;;  %v78_v19 = vld [vmem:[%s1637_s0 + $0xa0] sm:$0xff] }
  0x4f   :  { %v654_v11 = vpop.eup %653  ;;  %v379_v54 = vmul.f32 0.6931472, %v652_v9  ;;  %v421_v33 = vadd.f32 %v375_v18, %v1719_v10  ;;  %v1439_v53 = vadd.f32 %v1391_v41, %v419_v26  ;;  %v118_v18 = vld [vmem:[%s1639_s2 + $0x98] sm:$0xff]  ;;  %v1725_v26 = vld [vmem:[#allocation8_spill] sm:$0xff]  ;;  %665 = vlog2.f32 %v1726_v48 }
  0x50   :  { %v656_v55 = vpop.eup %655  ;;  %v381_v50 = vmul.f32 0.6931472, %v654_v11  ;;  %v422_v3 = vadd.f32 %v377_v20, %v1720_v56  ;;  %v1443_v57 = vadd.f32 %v1391_v41, %v420_v31  ;;  %v480_v0 = vadd.f32 %v479_v49, %v440_v30  ;;  %v1724_v30 = vld [vmem:[#allocation31_spill] sm:$0xff] }
  0x51   :  { %v658_v8 = vpop.eup %657  ;;  %v383_v17 = vmul.f32 0.6931472, %v656_v55  ;;  %v423_v34 = vadd.f32 %v379_v54, %v1721_v22  ;;  %v1448_v52 = vadd.f32 %v1391_v41, %v421_v33  ;;  %v251_v9 = vmul.f32 %v1725_v26, %v1381_v13  ;;  %v1727_v33 = vld [vmem:[#allocation10_spill] sm:$0xff] }
  0x52   :  { %v660_v1 = vpop.eup %659  ;;  %v385_v35 = vmul.f32 0.6931472, %v658_v8  ;;  %v424_v36 = vadd.f32 %v381_v50, %v1722_v7  ;;  %v1452_v38 = vadd.f32 %v1391_v41, %v422_v3  ;;  %v481_v59 = vadd.f32 %v480_v0, %v441_v62  ;;  %v1728_v50 = vld [vmem:[#allocation13_spill] sm:$0xff]  ;;  %v1729_v3 = vld [vmem:[#allocation12_spill] sm:$0xff]  ;;  %v1730_v8 = vld [vmem:[#allocation14_spill] sm:$0xff] }
  0x53   :  { %v662_v29 = vpop.eup %661  ;;  %v425_v44 = vadd.f32 %v383_v17, %v1723_v42  ;;  %v1457_v43 = vadd.f32 %v1391_v41, %v423_v34  ;;  %v333_v20 = vmul.f32 0.6931472, %v1413_v25  ;;  %v398_v62 = vadd.f32 %v329_v47, %v1424_v27  ;;  %v79_v27 = vld [vmem:[%s1637_s0 + $0xa8] sm:$0xff]  ;;  %v80_v17 = vld [vmem:[%s1637_s0 + $0xb0] sm:$0xff]  ;;  %v81_v7 = vld [vmem:[%s1637_s0 + $0xb8] sm:$0xff] }
  0x54   :  { %v1459_v40 = vpop.eup %663  ;;  %v426_v15 = vadd.f32 %v385_v35, %v1724_v30  ;;  %v1470_v23 = vadd.f32 %v1391_v41, %v424_v36  ;;  %v444_v11 = vadd.f32 %v1391_v41, %v396_v45  ;;  %v482_v25 = vadd.f32 %v481_v59, %v442_v4  ;;  %v120_v47 = vld [vmem:[%s1639_s2 + $0xa8] sm:$0xff]  ;;  %v1731_v4 = vld [vmem:[#allocation29_spill] sm:$0xff] }
  0x55   :  { %v1477_v31 = vadd.f32 %v1391_v41, %v425_v44  ;;  %v159_v54 = vsub.f32 %v77_v61, %v118_v18  ;;  %v198_v10 = vand.u32 2147483647, %v157_v12  ;;  %v253_v55 = vmul.f32 %v1727_v33, %v1383_v39  ;;  %v1732_v35 = vld [vmem:[#allocation15_spill] sm:$0xff]  ;;  %v122_v36 = vld [vmem:[%s1639_s2 + $0xb8] sm:$0xff]  ;;  %v1733_v61 = vld [vmem:[#allocation32_spill] sm:$0xff] }
  0x56   :  { %v1488_v13 = vadd.f32 %v1391_v41, %v426_v15  ;;  %667 = vlog2.f32 %v1728_v50  ;;  %v335_v45 = vmul.f32 0.6931472, %v1417_v63  ;;  %v399_v56 = vadd.f32 %v331_v21, %v1428_v37  ;;  %v121_v63 = vld [vmem:[%s1639_s2 + $0xb0] sm:$0xff]  ;;  %v1734_v30 = vld [vmem:[#allocation17_spill] sm:$0xff]  ;;  %v82_v15 = vld [vmem:[%s1637_s0 + $0xc0] sm:$0xff] }
  0x57   :  { %v445_v5 = vadd.f32 %v1391_v41, %v397_v28  ;;  %v483_v6 = vadd.f32 %v482_v25, %v443_v51  ;;  %v160_v12 = vsub.f32 %v78_v19, %v119_v46  ;;  %v199_v39 = vand.u32 2147483647, %v158_v60  ;;  %v123_v51 = vld [vmem:[%s1639_s2 + $0xc0] sm:$0xff]  ;;  %v83_v25 = vld [vmem:[%s1637_s0 + $0xc8] sm:$0xff] }
  0x58   :  { %v255_v49 = vmul.f32 %v1729_v3, %v1393_v14  ;;  %669 = vlog2.f32 %v1730_v8  ;;  %v337_v37 = vmul.f32 0.6931472, %v1421_v58  ;;  %v400_v22 = vadd.f32 %v333_v20, %v251_v9  ;;  %v1735_v46 = vld [vmem:[#allocation34_spill] sm:$0xff] }
  0x59   :  { %v446_v34 = vadd.f32 %v1391_v41, %v398_v62  ;;  %v484_v16 = vadd.f32 %v483_v6, %v444_v11  ;;  %v161_v2 = vsub.f32 %v79_v27, %v120_v47  ;;  %v200_v60 = vand.u32 2147483647, %v159_v54  ;;  %v666_v20 = vpop.eup %665  ;;  %v1736_v11 = vld [vmem:[#allocation19_spill] sm:$0xff]  ;;  %v84_v6 = vld [vmem:[%s1637_s0 + $0xd0] sm:$0xff] }
  0x5a   :  { %v257_v14 = vmul.f32 %v1731_v4, %v198_v10  ;;  %671 = vlog2.f32 %v1732_v35  ;;  %v339_v0 = vmul.f32 0.6931472, %v660_v1  ;;  %v401_v58 = vadd.f32 %v335_v45, %v253_v55  ;;  %v124_v54 = vld [vmem:[%s1639_s2 + $0xc8] sm:$0xff] }
  0x5b   :  { %v447_v21 = vadd.f32 %v1391_v41, %v399_v56  ;;  %v485_v28 = vadd.f32 %v484_v16, %v445_v5  ;;  %v162_v42 = vsub.f32 %v80_v17, %v121_v63  ;;  %v201_v44 = vand.u32 2147483647, %v160_v12  ;;  %v1737_v45 = vld [vmem:[#allocation35_spill] sm:$0xff]  ;;  %v1738_v5 = vld [vmem:[#allocation21_spill] sm:$0xff]  ;;  %v125_v12 = vld [vmem:[%s1639_s2 + $0xd0] sm:$0xff] }
  0x5c   :  { %v259_v18 = vmul.f32 %v1733_v61, %v199_v39  ;;  %673 = vlog2.f32 %v1734_v30  ;;  %v341_v59 = vmul.f32 0.6931472, %v662_v29  ;;  %v402_v1 = vadd.f32 %v337_v37, %v255_v49  ;;  %v1739_v37 = vld [vmem:[#allocation37_spill] sm:$0xff] }
  0x5d   :  { %v448_v26 = vadd.f32 %v1391_v41, %v400_v22  ;;  %v486_v9 = vadd.f32 %v485_v28, %v446_v34  ;;  %v163_v48 = vsub.f32 %v81_v7, %v122_v36  ;;  %v202_v19 = vand.u32 2147483647, %v161_v2  ;;  %v1740_v34 = vld [vmem:[#allocation23_spill] sm:$0xff]  ;;  %v85_v16 = vld [vmem:[%s1637_s0 + $0xd8] sm:$0xff] }
  0x5e   :  { %v261_v62 = vmul.f32 %v1735_v46, %v200_v60  ;;  %675 = vlog2.f32 %v1736_v11  ;;  %v343_v29 = vmul.f32 0.6931472, %v1459_v40  ;;  %v403_v10 = vadd.f32 %v339_v0, %v257_v14  ;;  %v126_v2 = vld [vmem:[%s1639_s2 + $0xd8] sm:$0xff] }
  0x5f   :  { %v449_v33 = vadd.f32 %v1391_v41, %v401_v58  ;;  %v487_v55 = vadd.f32 %v486_v9, %v447_v21  ;;  %v164_v27 = vsub.f32 %v82_v15, %v123_v51  ;;  %v203_v47 = vand.u32 2147483647, %v162_v42  ;;  %v1741_v58 = vld [vmem:[#allocation38_spill] sm:$0xff]  ;;  %v1742_v28 = vld [vmem:[#allocation25_spill] sm:$0xff] }
  0x60   :  { %v668_v50 = vpop.eup %667  ;;  %v263_v56 = vmul.f32 %v1737_v45, %v201_v44  ;;  %677 = vlog2.f32 %v1738_v5  ;;  %v345_v40 = vmul.f32 0.6931472, %v666_v20  ;;  %v404_v39 = vadd.f32 %v341_v59, %v259_v18  ;;  %v86_v42 = vld [vmem:[%s1637_s0 + $0xe0] sm:$0xff]  ;;  %v1744_v20 = vld [vmem:[#allocation27_spill] sm:$0xff] }
  0x61   :  { %v450_v3 = vadd.f32 %v1391_v41, %v402_v1  ;;  %v488_v49 = vadd.f32 %v487_v55, %v448_v26  ;;  %v165_v17 = vsub.f32 %v83_v25, %v124_v54  ;;  %v204_v63 = vand.u32 2147483647, %v163_v48  ;;  %v127_v44 = vld [vmem:[%s1639_s2 + $0xe0] sm:$0xff]  ;;  %v1743_v26 = vld [vmem:[#allocation39_spill] sm:$0xff] }
  0x62   :  { %v670_v8 = vpop.eup %669  ;;  %v265_v22 = vmul.f32 %v1739_v37, %v202_v19  ;;  %679 = vlog2.f32 %v1740_v34  ;;  %v347_v60 = vmul.f32 0.6931472, %v668_v50  ;;  %v405_v4 = vadd.f32 %v343_v29, %v261_v62  ;;  %v87_v48 = vld [vmem:[%s1637_s0 + $0xe8] sm:$0xff]  ;;  %v1746_v50 = vld [vmem:[#allocation30_spill] sm:$0xff] }
  0x63   :  { %v451_v14 = vadd.f32 %v1391_v41, %v403_v10  ;;  %v489_v35 = vadd.f32 %v488_v49, %v449_v33  ;;  %v166_v36 = vsub.f32 %v84_v6, %v125_v12  ;;  %v205_v0 = vand.u32 2147483647, %v164_v27  ;;  %v128_v19 = vld [vmem:[%s1639_s2 + $0xe8] sm:$0xff]  ;;  %v1745_v33 = vld [vmem:[#allocation40_spill] sm:$0xff] }
  0x64   :  { %v672_v7 = vpop.eup %671  ;;  %v267_v21 = vmul.f32 %v1741_v58, %v203_v47  ;;  %681 = vlog2.f32 %v1742_v28  ;;  %v349_v61 = vmul.f32 0.6931472, %v670_v8  ;;  %v406_v18 = vadd.f32 %v345_v40, %v263_v56  ;;  %v88_v27 = vld [vmem:[%s1637_s0 + $0xf0] sm:$0xff]  ;;  %v1748_v8 = vld [vmem:[#allocation33_spill] sm:$0xff] }
  0x65   :  { %v452_v30 = vadd.f32 %v1391_v41, %v404_v39  ;;  %v490_v15 = vadd.f32 %v489_v35, %v450_v3  ;;  %v167_v59 = vsub.f32 %v85_v16, %v126_v2  ;;  %v206_v1 = vand.u32 2147483647, %v165_v17  ;;  %v129_v47 = vld [vmem:[%s1639_s2 + $0xf0] sm:$0xff]  ;;  %v1747_v3 = vld [vmem:[#allocation41_spill] sm:$0xff] }
  0x66   :  { %v674_v51 = vpop.eup %673  ;;  %v269_v9 = vmul.f32 %v1743_v26, %v204_v63  ;;  %683 = vlog2.f32 %v1744_v20  ;;  %v351_v46 = vmul.f32 0.6931472, %v672_v7  ;;  %v407_v62 = vadd.f32 %v347_v60, %v265_v22  ;;  %v89_v17 = vld [vmem:[%s1637_s0 + $0xf8] sm:$0xff]  ;;  %v1750_v7 = vld [vmem:[#allocation36_spill] sm:$0xff] }
  0x67   :  { %v453_v11 = vadd.f32 %v1391_v41, %v405_v4  ;;  %v491_v25 = vadd.f32 %v490_v15, %v451_v14  ;;  %v168_v29 = vsub.f32 %v86_v42, %v127_v44  ;;  %v207_v10 = vand.u32 2147483647, %v166_v36  ;;  %v130_v63 = vld [vmem:[%s1639_s2 + $0xf8] sm:$0xff]  ;;  %v1749_v14 = vld [vmem:[#allocation42_spill] sm:$0xff] }
  0x68   :  { %v676_v54 = vpop.eup %675  ;;  %v271_v55 = vmul.f32 %v1745_v33, %v205_v0  ;;  %685 = vlog2.f32 %v1746_v50  ;;  %v353_v45 = vmul.f32 0.6931472, %v674_v51  ;;  %v408_v56 = vadd.f32 %v349_v61, %v267_v21  ;;  %v90_v36 = vld [vmem:[%s1637_s0 + $0x100] sm:$0xff]  ;;  %v1753_v33 = vld [vmem:[#allocation45_spill] sm:$0xff] }
  0x69   :  { %v454_v5 = vadd.f32 %v1391_v41, %v406_v18  ;;  %v492_v6 = vadd.f32 %v491_v25, %v452_v30  ;;  %v169_v40 = vsub.f32 %v87_v48, %v128_v19  ;;  %v208_v39 = vand.u32 2147483647, %v167_v59  ;;  %v131_v0 = vld [vmem:[%s1639_s2 + $0x100] sm:$0xff]  ;;  %v1751_v30 = vld [vmem:[#allocation43_spill] sm:$0xff]  ;;  %v1752_v19 = vld [vmem:[#allocation44_spill] sm:$0xff] }
  0x6a   :  { %v678_v12 = vpop.eup %677  ;;  %v273_v49 = vmul.f32 %v1747_v3, %v206_v1  ;;  %687 = vlog2.f32 %v1748_v8  ;;  %v355_v37 = vmul.f32 0.6931472, %v676_v54  ;;  %v409_v22 = vadd.f32 %v351_v46, %v269_v9 }
  0x6b   :  { %v455_v34 = vadd.f32 %v1391_v41, %v407_v62  ;;  %v493_v16 = vadd.f32 %v492_v6, %v453_v11  ;;  %v170_v60 = vsub.f32 %v88_v27, %v129_v47  ;;  %v209_v4 = vand.u32 2147483647, %v168_v29  ;;  %v1754_v6 = vld [vmem:[#allocation46_spill] sm:$0xff] }
  0x6c   :  { %v680_v2 = vpop.eup %679  ;;  %v275_v35 = vmul.f32 %v1749_v14, %v207_v10  ;;  %689 = vlog2.f32 %v1750_v7  ;;  %v357_v58 = vmul.f32 0.6931472, %v678_v12  ;;  %v410_v21 = vadd.f32 %v353_v45, %v271_v55 }
  0x6d   :  { %v456_v28 = vadd.f32 %v1391_v41, %v408_v56  ;;  %v494_v42 = vadd.f32 %v493_v16, %v454_v5  ;;  %v171_v61 = vsub.f32 %v89_v17, %v130_v63  ;;  %v210_v18 = vand.u32 2147483647, %v169_v40 }
  0x6e   :  { %v682_v44 = vpop.eup %681  ;;  %v277_v15 = vmul.f32 %v1751_v30, %v208_v39  ;;  %v359_v51 = vmul.f32 0.6931472, %v680_v2  ;;  %v411_v59 = vadd.f32 %v355_v37, %v273_v49  ;;  %v457_v1 = vadd.f32 %v1391_v41, %v409_v22 }
  0x6f   :  { %v495_v26 = vadd.f32 %v494_v42, %v455_v34  ;;  %v172_v20 = vsub.f32 %v90_v36, %v131_v0  ;;  %v211_v48 = vand.u32 2147483647, %v170_v60  ;;  %v279_v46 = vmul.f32 %v1752_v19, %v209_v4 }
  0x70   :  { %v684_v9 = vpop.eup %683  ;;  %v361_v62 = vmul.f32 0.6931472, %v682_v44  ;;  %v412_v11 = vadd.f32 %v357_v58, %v275_v35  ;;  %v458_v25 = vadd.f32 %v1391_v41, %v410_v21  ;;  %v212_v10 = vand.u32 2147483647, %v171_v61 }
  0x71   :  { %v496_v54 = vadd.f32 %v495_v26, %v456_v28  ;;  %v281_v55 = vmul.f32 %v1753_v33, %v210_v18  ;;  %v363_v50 = vmul.f32 0.6931472, %v684_v9  ;;  %v413_v27 = vadd.f32 %v359_v51, %v277_v15 }
  0x72   :  { %v686_v29 = vpop.eup %685  ;;  %v459_v47 = vadd.f32 %v1391_v41, %v411_v59  ;;  %v213_v5 = vand.u32 2147483647, %v172_v20  ;;  %v283_v12 = vmul.f32 %v1754_v6, %v211_v48  ;;  %v414_v39 = vadd.f32 %v361_v62, %v279_v46 }
  0x73   :  { %v497_v45 = vadd.f32 %v496_v54, %v457_v1  ;;  %v365_v40 = vmul.f32 0.6931472, %v686_v29  ;;  %v460_v3 = vadd.f32 %v1391_v41, %v412_v11  ;;  %v285_v17 = vmul.f32 %v1356_v24, %v212_v10 }
  0x74   :  { %v688_v56 = vpop.eup %687  ;;  %v415_v37 = vadd.f32 %v363_v50, %v281_v55  ;;  %v461_v22 = vadd.f32 %v1391_v41, %v413_v27  ;;  %v287_v16 = vmul.f32 %v1371_v32, %v213_v5  ;;  %v462_v4 = vadd.f32 %v1391_v41, %v414_v39 }
  0x75   :  { %v498_v49 = vadd.f32 %v497_v45, %v458_v25  ;;  %v367_v63 = vmul.f32 0.6931472, %v688_v56  ;;  %v416_v60 = vadd.f32 %v365_v40, %v283_v12 }
  0x76   :  { %v690_v8 = vpop.eup %689  ;;  %v463_v7 = vadd.f32 %v1391_v41, %v415_v37 }
  0x77   :  { %v499_v34 = vadd.f32 %v498_v49, %v459_v47  ;;  %v369_v2 = vmul.f32 0.6931472, %v690_v8  ;;  %v417_v35 = vadd.f32 %v367_v63, %v285_v17  ;;  %v464_v58 = vadd.f32 %v1391_v41, %v416_v60 }
  0x79   :  { %v500_v14 = vadd.f32 %v499_v34, %v460_v3  ;;  %v418_v0 = vadd.f32 %v369_v2, %v287_v16  ;;  %v465_v21 = vadd.f32 %v1391_v41, %v417_v35 }
  0x7b   :  { %v501_v36 = vadd.f32 %v500_v14, %v461_v22  ;;  %v466_v42 = vadd.f32 %v1391_v41, %v418_v0 }
  0x7d   :  { %v502_v24 = vadd.f32 %v501_v36, %v462_v4 }
  0x7f   :  { %v503_v28 = vadd.f32 %v502_v24, %v463_v7 }
  0x81   :  { %v504_v44 = vadd.f32 %v503_v28, %v464_v58 }
  0x83   :  { %v505_v32 = vadd.f32 %v504_v44, %v465_v21 }
  0x85   :  { %v506_v61 = vadd.f32 %v505_v32, %v466_v42 }
  0x87   :  { %v507_v18 = vadd.f32 %v506_v61, %v1439_v53 }
  0x89   :  { %v508_v30 = vadd.f32 %v507_v18, %v1443_v57 }
  0x8b   :  { %v509_v15 = vadd.f32 %v508_v30, %v1448_v52 }
  0x8d   :  { %v510_v51 = vadd.f32 %v509_v15, %v1452_v38 }
  0x8f   :  { %v511_v59 = vadd.f32 %v510_v51, %v1457_v43 }
  0x91   :  { %v512_v1 = vadd.f32 %v511_v59, %v1470_v23 }
  0x93   :  { %v513_v26 = vadd.f32 %v512_v1, %v1477_v31 }
  0x95   :  { %v514_v9 = vadd.f32 %v513_v26, %v1488_v13 }
  0x97   :  { %v515_v41 = vrot.slane %v514_v9, 4 }
  0x99   :  { %v516_v20 = vadd.f32 %v515_v41, %v514_v9 }
  0x9b   :  { %v517_v48 = vrot.slane %v516_v20, 2 }
  0x9d   :  { %v518_v19 = vadd.f32 %v517_v48, %v516_v20 }
  0x9f   :  { %v519_v46 = vrot.slane %v518_v19, 1 }
  0xa1   :  { %v520_v53 = vadd.f32 %v519_v46, %v518_v19 }
  0xa3   :  { %521 = vst [vmem:[%s1641_s4] sm:$0x1] %v520_v53 }

</bundles_post_ra>
